<compile_context>
chip_gen: v7x
topology: tpu7x:2x2x1
jax: 0.10.0
libtpu: 0.0.40
codegen_flags: <defaults>
</compile_context>

<pallas_src>
import jax
import jax.numpy as jnp
from jax import lax
from jax.experimental import pallas as pl
from jax.experimental.pallas import tpu as pltpu

_EPS = 1e-12                         # torch.nn.functional.normalize default eps
_VOCAB_TILE_BYTES = 2 * 1024 * 1024  # per-buffer bf16 vocab-tile budget (~2 MiB)


def _round_up(x: int, m: int) -> int:
    return pl.cdiv(x, m) * m


# ---------------------------------------------------------------------------
# Init-only kernel: row-wise L2 normalization of the cached vocab table
# (f32 VPU/EUP math, bf16 output).  Runs once per predictor construction.
# ---------------------------------------------------------------------------
def _l2norm_kernel(x_ref, o_ref):
    x = x_ref[...].astype(jnp.float32)
    sumsq = jnp.sum(x * x, axis=-1, keepdims=True)
    # 1 / max(||x||, eps) == rsqrt(max(sumsq, eps^2)).  rsqrt runs on the EUP
    # (its own VLIW slot) and the clamp keeps torch.F.normalize zero-row
    # behaviour (padded all-zero rows normalize to zero, no inf/nan).
    inv = lax.rsqrt(jnp.maximum(sumsq, jnp.float32(_EPS) ** 2))
    o_ref[...] = (x * inv).astype(o_ref.dtype)


def _l2_normalize_rows(x_padded, *, out_dtype=jnp.bfloat16):
    r, d = x_padded.shape
    row_tile = 128 if r % 128 == 0 else 8    # init-only; overhead irrelevant
    assert r % row_tile == 0 and d % 128 == 0
    return pl.pallas_call(
        _l2norm_kernel,
        out_shape=jax.ShapeDtypeStruct((r, d), out_dtype),
        grid=(r // row_tile,),
        in_specs=[pl.BlockSpec((row_tile, d), lambda i: (i, 0))],
        out_specs=pl.BlockSpec((row_tile, d), lambda i: (i, 0)),
        compiler_params=pltpu.CompilerParams(
            dimension_semantics=("parallel",)),
    )(x_padded)


# ---------------------------------------------------------------------------
# Forward kernel: fused frame-normalize + cosine-similarity matmul,
# tiled over the vocab axis.
# ---------------------------------------------------------------------------
def _sim_kernel(zi_ref, zvt_ref, o_ref):
    # zi_ref : [N_pad, D_pad] f32 raw (zero-padded) frame embeddings; same
    #          block index every grid step -> DMA'd once, resident in VMEM.
    # zvt_ref: [D_pad, TV]   bf16 pre-normalized, pre-transposed vocab tile
    #          (streamed / double-buffered along the grid).
    # o_ref  : [N_pad, TV]   f32 scores tile; V sits on the 128-lane axis so
    #          stores are unmasked / lane-dense.
    zi = zi_ref[...]
    sumsq = jnp.sum(zi * zi, axis=-1, keepdims=True)
    inv = lax.rsqrt(jnp.maximum(sumsq, jnp.float32(_EPS) ** 2))
    zin = (zi * inv).astype(jnp.bfloat16)            # fused frame normalize
    o_ref[...] = lax.dot_general(
        zin, zvt_ref[...],
        dimension_numbers=(((1,), (0,)), ((), ())),  # plain [N,D] @ [D,TV]
        preferred_element_type=jnp.float32,
    ).astype(o_ref.dtype)


class ZeroShotPredictor:
    """Pallas port of the EgoVLP ZeroShotPredictor module."""

    def __init__(self, z_vocab: jax.Array, *, v_tile: int | None = None):
        # TODO(synk): model.encode_text(vocab, prompt) (frozen text tower +
        # tokenizer/checkpoint) has no in-script equivalent; callers pass the
        # precomputed Z_vocab [V, D] table instead.
        V, D = z_vocab.shape
        self._V, self._D = V, D
        self._d_pad = _round_up(D, 128)

        # Vocab tile sized from the VMEM budget, lane-aligned, never larger
        # than the (padded) vocab itself.
        v128 = _round_up(V, 128)
        tv_budget = max(128, (_VOCAB_TILE_BYTES // (self._d_pad * 2)) // 128 * 128)
        if v_tile is not None:
            tv_budget = min(tv_budget, max(128, _round_up(v_tile, 128)))
        self._tv = min(tv_budget, v128)
        steps = pl.cdiv(v128, self._tv)
        if steps > 1 and steps % 2 == 1:
            steps += 1               # even step count -> clean v7x megacore split
        self._steps = steps
        self._v_pad = steps * self._tv

        zv = jnp.pad(z_vocab.astype(jnp.float32),
                     ((0, self._v_pad - V), (0, self._d_pad - D)))
        # Normalize ONCE (hoisted out of forward), cache in bf16 (halves the
        # dominant HBM table stream; int8/fp8 table compression would halve it
        # again but changes numerics, so it is intentionally left out), and
        # store pre-transposed so the forward matmul needs no per-tile
        # transpose.  Both are one-time init costs.
        zv_n = _l2_normalize_rows(zv)                # [V_pad, D_pad] bf16
        self._zvt_table = jnp.transpose(zv_n)        # [D_pad, V_pad] bf16

    def __call__(self, z_image: jax.Array) -> jax.Array:
        """forward(Z_image[N, D]) -> scores[V, N] (cosine similarities)."""
        N, D = z_image.shape
        assert D == self._D, "embedding dims must match"
        n_pad = _round_up(N, 16)     # bf16 packs 16 rows per vreg
        zi = jnp.pad(z_image.astype(jnp.float32),
                     ((0, n_pad - N), (0, self._d_pad - D)))

        scores_nv = pl.pallas_call(
            _sim_kernel,
            out_shape=jax.ShapeDtypeStruct((n_pad, self._v_pad), jnp.float32),
            grid=(self._steps,),
            in_specs=[
                # Frame block: same block every step -> resident in VMEM.
                pl.BlockSpec((n_pad, self._d_pad), lambda i: (0, 0)),
                # Vocab tile: streamed / double-buffered along the grid.
                pl.BlockSpec((self._d_pad, self._tv), lambda i: (0, i)),
            ],
            out_specs=pl.BlockSpec((n_pad, self._tv), lambda i: (0, i)),
            # V tiles are independent -> "parallel" lets v7x shard them across
            # its 2 TensorCores.  Per-step VMEM (2x bf16 vocab tile + resident
            # f32 zi + 2x f32 output tile) stays well under every generation's
            # scoped-VMEM default (16 MiB on v5e), so no vmem_limit_bytes
            # override is required.
            compiler_params=pltpu.CompilerParams(
                dimension_semantics=("parallel",)),
        )(zi, self._zvt_table)

        # Module contract is [V, N]; the kernel produced the lane-dense [N, V]
        # layout, so slice the padding off and transpose the tiny result once.
        return scores_nv[:N, :self._V].T


# ---------------------------------------------------------------------------
# References for the correctness check.
# ---------------------------------------------------------------------------
def _reference_f32(zv, zi):
    """Exact torch-style reference: f32 normalize + f32 matmul."""
    eps = 1e-12
    zvn = zv / jnp.maximum(jnp.linalg.norm(zv, axis=-1, keepdims=True), eps)
    zin = zi / jnp.maximum(jnp.linalg.norm(zi, axis=-1, keepdims=True), eps)
    return zvn @ zin.T


def _reference_bf16(zv, zi):
    """Mirrors kernel numerics: f32 rsqrt-normalize -> bf16 operands -> f32 acc."""
    eps2 = jnp.float32(_EPS) ** 2

    def norm(x):
        ss = jnp.sum(x * x, axis=-1, keepdims=True)
        return (x * lax.rsqrt(jnp.maximum(ss, eps2))).astype(jnp.bfloat16)

    return jnp.dot(norm(zv), norm(zi).T, preferred_element_type=jnp.float32)


if __name__ == "__main__":
    # Charades-Ego-sized vocab, 2 frame embeddings, EgoVLP projection dim.
    V, N, D = 157, 2, 256

    key = jax.random.PRNGKey(0)
    k_vocab, k_image = jax.random.split(key)

    # Deterministic synthetic "encode_text(vocab, prompt)" output.
    Z_vocab = jax.random.normal(k_vocab, (V, D), dtype=jnp.float32)
    # Frame embeddings (the forward() input).
    Z_image = jax.random.normal(k_image, (N, D), dtype=jnp.float32)

    ref_bf16 = _reference_bf16(Z_vocab, Z_image)
    ref_f32 = _reference_f32(Z_vocab, Z_image)

    # Run twice: once with the auto-derived (single-step) tile and once with a
    # forced small tile so the multi-step streamed/double-buffered path is
    # exercised even at this tiny demo vocab.
    for v_tile in (None, 128):
        predictor = ZeroShotPredictor(Z_vocab, v_tile=v_tile)
        scores = jax.block_until_ready(predictor(Z_image))
        assert scores.shape == (V, N)

        # Tight check against a reference with identical bf16-input numerics.
        assert jnp.allclose(scores, ref_bf16, atol=1e-3, rtol=1e-3), \
            f"mismatch vs bf16-mirrored reference (v_tile={v_tile})"

        # Looser check vs the exact f32 torch-style reference: tolerance
        # loosened deliberately for bf16 MXU operands (cosine scores <= 1).
        assert jnp.allclose(scores, ref_f32, atol=2e-2, rtol=0.0), \
            f"mismatch vs f32 reference (v_tile={v_tile})"

    print("KERNEL_OK")
</pallas_src>

<mosaic_0001>
module attributes {stable_mosaic.version = 11 : i64} {
  func.func @_l2norm_kernel(%arg0: i32, %arg1: memref<128x256xf32, #tpu.memory_space<vmem>>, %arg2: memref<128x256xbf16, #tpu.memory_space<vmem>>) attributes {dimension_semantics = [#tpu.dimension_semantics<parallel>], iteration_bounds = array<i64: 2>, scalar_prefetch = 0 : i64, scratch_operands = 0 : i64, tpu.core_type = #tpu.core_type<tc>, window_params = [{transform_indices = @transform_0, window_bounds = array<i64: 128, 256>}, {transform_indices = @transform_1, window_bounds = array<i64: 128, 256>}]} {
    %c0 = arith.constant 0 : index
    %c0_0 = arith.constant 0 : index
    %0 = vector.load %arg1[%c0, %c0_0] : memref<128x256xf32, #tpu.memory_space<vmem>>, vector<128x256xf32>
    %1 = arith.mulf %0, %0 : vector<128x256xf32>
    %cst = arith.constant dense<0.000000e+00> : vector<128xf32>
    %2 = vector.multi_reduction <add>, %1, %cst [1] : vector<128x256xf32> to vector<128xf32>
    %3 = vector.shape_cast %2 : vector<128xf32> to vector<128x1xf32>
    %cst_1 = arith.constant 9.99999996E-13 : f32
    %4 = arith.mulf %cst_1, %cst_1 : f32
    %5 = vector.broadcast %4 : f32 to vector<128x1xf32>
    %6 = arith.maximumf %3, %5 : vector<128x1xf32>
    %7 = math.rsqrt %6 : vector<128x1xf32>
    %8 = vector.broadcast %7 : vector<128x1xf32> to vector<128x256xf32>
    %9 = arith.mulf %0, %8 : vector<128x256xf32>
    %10 = arith.truncf %9 : vector<128x256xf32> to vector<128x256xbf16>
    %c0_2 = arith.constant 0 : index
    %c0_3 = arith.constant 0 : index
    %11 = vector.load %arg2[%c0_2, %c0_3] : memref<128x256xbf16, #tpu.memory_space<vmem>>, vector<128x256xbf16>
    tpu.vector_store %arg2[%c0_2, %c0_3], %10 {strides = array<i32>} : memref<128x256xbf16, #tpu.memory_space<vmem>>, vector<128x256xbf16>,
    return
  }
  func.func @transform_0(%arg0: i32) -> (i32, i32) {
    %c0_i32 = arith.constant 0 : i32
    %c0_i32_0 = arith.constant 0 : i32
    return %arg0, %c0_i32 : i32, i32
  }
  func.func @transform_1(%arg0: i32) -> (i32, i32) {
    %c0_i32 = arith.constant 0 : i32
    %c0_i32_0 = arith.constant 0 : i32
    return %arg0, %c0_i32 : i32, i32
  }
}

</mosaic_0001>

<bundles_post_ra>
// kernel: tpu_custom_call.1
= control target key start
LH: loop header
LB: loop body
LE: loop exit
PB: predicated region body
PF: predicated region fallthrough
CT: control target
= control target key end

     0   :  { %6 = vsyncpa [#allocation3], 0  ;;  %s1138_s0 = inlined_call_operand.hbm [shape: f32[256,256], index: 0, kind: input, shape index: {}]   ;;  %s1139_s1 = inlined_call_operand.hbm [shape: bf16[256,256], index: 1, kind: output, shape index: {}]  }
   0x1   :  { %8 = vsyncpa [#allocation3 + $0x1], 0 }
   0x2   :  { %9 = vsyncpa [#allocation4], 0 }
   0x3   :  { %11 = vsyncpa [#allocation4 + $0x1], 0  ;;  %s762_s6 = smov 0   ;;  %s764_s7 = smov 0  }
   0x4   :  { %s766_s8 = smov 0   ;;  %s768_s9 = smov 0  }
   0x5 LB: > { %s783_s10 = sadd.s32 4294967295, %s744_s9   ;;  %s514_s11 = sadd.s32 4294967294, %s744_s9   ;;  %s744_s9 = sphi %s768_s9, %s1152_s9   ;;  %s740_s8 = sphi %s766_s8, %s1151_s8   ;;  %s736_s7 = sphi %s764_s7, %s1150_s7   ;;  %s732_s6 = sphi %s762_s6, %s1149_s6  }
   0x6   : > { %s787_s12 = sadd.s32 1, %s744_s9   ;;  %s24_s13 = sadd.s32 1, %s740_s8 }
   0x7   : > { %s21_s14 = ssub.s32 %s744_s9, %s787_s12  ;;  %p31_p0 = scmp.ne.s32.totalorder %s740_s8, %s736_s7 }
   0x8   : > { %p22_p1 = scmp.eq.s32.totalorder %s21_s14, 0  ;;  %p32_p2 = scmp.eq.s32.totalorder %s744_s9, 0 }
   0x9   : > { %p37_p3 = scmp.ne.s32.totalorder %s736_s7, %s732_s6  ;;  %p38_p4 = scmp.eq.s32.totalorder %s783_s10, 0 }
   0xa   : > { %s799_s15 = scalar_select %p22_p1, %s740_s8, %s24_s13  }
   0xb   : > { %p801_p5 = por %p32_p2, %p31_p0  ;;  %p805_p6 = por %p38_p4, %p37_p3 }
   0xc   : > { %p61_p7 = scmp.eq.s32.totalorder %s783_s10, 1  ;;  %p67_p8 = scmp.eq.s32.totalorder %s514_s11, 1 }
   0xd   : > { %p578_p10 = scmp.lt.s32.totalorder %s744_s9, 2  ;;  %s87_s20 = sand.u32 1, %s740_s8  }
   0xe   : > { %p812_p11 = por %p61_p7, %p31_p0  ;;  %p816_p12 = por %p67_p8, %p37_p3 }
   0xf   : > { %s547_s21 = sshll.u32 %s744_s9, 12  ;;  %s517_s22 = sshll.u32 %s87_s20, 8 }
  0x10   : > { %s1143_s18 = scalar_select %p812_p11, 1, 0 }
  0x11   : > { %s1144_s19 = scalar_select %p816_p12, 1, 0 }
  0x12   : > { %s825_s25 = scalar_lea.hbm %s1138_s0, %s547_s21  ;;  %s91_s26 = scalar_lea.vmem [#allocation2], %s517_s22 }
  0x13   : > { %s99_s27 = sshll.u32 %s91_s26, 4  ;;  %p829_p13 = pnand %p578_p10, %p801_p5  ;;  %s833_s27 = int_to_ptr.vmem [resolvable:$true] %s99_s27 }
  0x14   : > { %s835_s29 = scalar_lea.sflag [#allocation3], %s87_s20  ;;  %s648_s30 = scalar_lea.hbm %s825_s25, 4096 }
  0x15   : > { %p649_p0 = scmp.ne.s32.totalorder %s825_s25, %s648_s30  ;;  %p650_p1 = pneg %p829_p13 }
  0x16   : > { %s653_s4 = scalar_lea.hbm %s1138_s0, 8192  ;;  %p654_p4 = scmp.lt.u32.totalorder %s825_s25, %s1138_s0 }
  0x17   : > { %p651_p2 = pnand %p650_p1, %p649_p0  ;;  %p655_p5 = scmp.lt.u32.totalorder %s653_s4, %s648_s30 }
  0x18   : > { %p657_p8 = scmp.lt.u32.totalorder %s648_s30, %s825_s25 }
  0x19   : > { %p652_p3 = pneg %p651_p2  ;;  %p656_p7 = por %p655_p5, %p654_p4 }
  0x1b   : > { %p658_p10 = por %p657_p8, %p656_p7 }
  0x1d   : > { %p659_p9 = pnand %p658_p10, %p652_p3 }
  0x1f   : > { %662 = shalt.err (!%p659_p9)
}
  0x20   : > { %s663_s13 = scalar_lea.vmem %s833_s27, 4096  ;;  %s746_s14 = smov [#allocation2]  }
  0x21   : > { %p664_p0 = scmp.ne.s32.totalorder %s833_s27, %s663_s13  ;;  %s668_s16 = sshll.u32 %s746_s14, 4  ;;  %s669_s16 = int_to_ptr.vmem [resolvable:$false] %s668_s16 }
  0x22   : > { %s670_s20 = scalar_lea.vmem %s669_s16, 8192  ;;  %p671_p11 = scmp.lt.s32.totalorder %s833_s27, %s669_s16 }
  0x23   : > { %p666_p2 = pnand %p664_p0, %p650_p1  ;;  %p672_p4 = scmp.lt.s32.totalorder %s670_s20, %s663_s13 }
  0x25   : > { %p667_p12 = pneg %p666_p2  ;;  %p673_p5 = por %p672_p4, %p671_p11 }
  0x27   : > { %p674_p7 = pnand %p673_p5, %p667_p12 }
  0x29   : > { %677 = shalt.err (!%p674_p7)
}
  0x2a   : > { %s747_s21 = smov 256   ;;  %s748_s22 = smov 16  }
  0x2b   : > { %573 = dma.hbm_to_vmem [thread:$0]  (!%p829_p13), %s825_s25, 4096, %s833_s27, %s835_s29, %s747_s21, %s747_s21, %s748_s22  }
  0x2c   : > { %p521_p9 = scmp.ge.s32.totalorder %s744_s9, 1  ;;  %p107_p1 = scmp.lt.s32.totalorder %s744_s9, 3 }
  0x2e   : > { %p108_p3 = pnand %p521_p9, %p107_p1 }
  0x2f   : > { %s866_s23 = sand.u32 (!%p108_p3), 1, %s736_s7  }
  0x30   : > { %111 = sbr.rel (%p108_p3) target bundleno = 264 (0x108), region = 24  ;;  %s522_s24 = sshll.u32 (!%p108_p3), %s866_s23, 8 }
  0x31   : > { %s114_s26 = scalar_lea.sflag (!%p108_p3), [#allocation3], %s866_s23  ;;  %s870_s30 = scalar_lea.vmem (!%p108_p3), [#allocation2], %s522_s24 }
  0x37   : > { %723 = dma.done.wait (%p805_p6), %s114_s26, 4096  }
  0x38   : > { %725 = vsyncadd (%p805_p6), %s114_s26, 4294963200  ;;  %v877_v0 = vld [vmem:[%s870_s30 + $0x20] sm:$0xff]  ;;  %v880_v1 = vld [vmem:[%s870_s30 + $0x28] sm:$0xff]  ;;  %s523_s17 = sshll.u32 %s866_s23, 7  ;;  %s565_s27 = sshll.u32 %s783_s10, 11 }
  0x39   : > { %v883_v2 = vld [vmem:[%s870_s30] sm:$0xff]  ;;  %v174_v3 = vmul.f32 %v877_v0, %v877_v0  ;;  %v175_v4 = vmul.f32 %v880_v1, %v880_v1  ;;  %v890_v5 = vld [vmem:[%s870_s30 + $0x8] sm:$0xff]  ;;  %v895_v7 = vld [vmem:[%s870_s30 + $0x30] sm:$0xff]  ;;  %s1041_s25 = scalar_lea.vmem [#allocation5], %s523_s17  ;;  %s1090_s3 = scalar_lea.hbm %s1139_s1, %s565_s27 }
  0x3a   : > { %v170_v6 = vmul.f32 %v883_v2, %v883_v2  ;;  %v898_v8 = vld [vmem:[%s870_s30 + $0x38] sm:$0xff]  ;;  %v171_v9 = vmul.f32 %v890_v5, %v890_v5  ;;  %v176_v10 = vmul.f32 %v895_v7, %v895_v7  ;;  %v907_v12 = vld [vmem:[%s870_s30 + $0x10] sm:$0xff]  ;;  %v923_v19 = vld [vmem:[%s870_s30 + $0x40] sm:$0xff]  ;;  %s441_s28 = sshll.u32 %s1041_s25, 4  ;;  %s427_s10 = scalar_lea.sflag [#allocation4], %s866_s23  ;;  %s1092_s28 = int_to_ptr.vmem [resolvable:$true] %s441_s28 }
  0x3b   : > { %v177_v11 = vmul.f32 %v898_v8, %v898_v8  ;;  %v910_v13 = vld [vmem:[%s870_s30 + $0x18] sm:$0xff]  ;;  %v913_v14 = vld [vmem:[%s870_s30 + $0x50] sm:$0xff]  ;;  %v208_v15 = vadd.f32 %v175_v4, %v174_v3  ;;  %v172_v16 = vmul.f32 %v907_v12, %v907_v12  ;;  %v926_v20 = vld [vmem:[%s870_s30 + $0x48] sm:$0xff]  ;;  %v178_v26 = vmul.f32 %v923_v19, %v923_v19  ;;  %s678_s4 = scalar_lea.vmem %s1092_s28, 2048  ;;  %p1146_p11 = scmp.ne.s32.totalorder %s1143_s18, 0 }
  0x3c   : > { %v173_v17 = vmul.f32 %v910_v13, %v910_v13  ;;  %v920_v18 = vld [vmem:[%s870_s30 + $0x58] sm:$0xff]  ;;  %v202_v21 = vadd.f32 %v171_v9, %v170_v6  ;;  %v180_v23 = vmul.f32 %v913_v14, %v913_v14  ;;  %v179_v27 = vmul.f32 %v926_v20, %v926_v20  ;;  %v937_v28 = vld [vmem:[%s870_s30 + $0x70] sm:$0xff]  ;;  %v943_v30 = vld [vmem:[%s870_s30 + $0x60] sm:$0xff]  ;;  %p679_p6 = scmp.ne.s32.totalorder %s1092_s28, %s678_s4  ;;  %s749_s5 = smov [#allocation5]  }
  0x3d   : > { %209 = vadd.xlane.f32.xlu1 %v208_v15  ;;  %v211_v22 = vadd.f32 %v177_v11, %v176_v10  ;;  %v181_v24 = vmul.f32 %v920_v18, %v920_v18  ;;  %v940_v29 = vld [vmem:[%s870_s30 + $0x78] sm:$0xff]  ;;  %v946_v31 = vld [vmem:[%s870_s30 + $0x68] sm:$0xff]  ;;  %v184_v33 = vmul.f32 %v937_v28, %v937_v28  ;;  %v182_v36 = vmul.f32 %v943_v30, %v943_v30  ;;  %v957_v38 = vld [vmem:[%s870_s30 + $0x90] sm:$0xff]  ;;  %s682_s11 = sshll.u32 %s749_s5, 4  ;;  %s683_s11 = int_to_ptr.vmem [resolvable:$false] %s682_s11 }
  0x3e   : > { %203 = vadd.xlane.f32.xlu0 %v202_v21  ;;  %v205_v25 = vadd.f32 %v173_v17, %v172_v16  ;;  %v185_v34 = vmul.f32 %v940_v29, %v940_v29  ;;  %v214_v35 = vadd.f32 %v179_v27, %v178_v26  ;;  %v183_v37 = vmul.f32 %v946_v31, %v946_v31  ;;  %v960_v39 = vld [vmem:[%s870_s30 + $0x98] sm:$0xff]  ;;  %v963_v40 = vld [vmem:[%s870_s30 + $0x80] sm:$0xff]  ;;  %v966_v41 = vld [vmem:[%s870_s30 + $0x88] sm:$0xff]  ;;  %p680_p12 = pnand %p679_p6, %p1146_p11  ;;  %s684_s13 = scalar_lea.vmem %s683_s11, 4096 }
  0x3f   : > { %v217_v32 = vadd.f32 %v181_v24, %v180_v23  ;;  %v188_v43 = vmul.f32 %v957_v38, %v957_v38  ;;  %v189_v44 = vmul.f32 %v960_v39, %v960_v39  ;;  %v186_v46 = vmul.f32 %v963_v40, %v963_v40  ;;  %v977_v48 = vld [vmem:[%s870_s30 + $0xb0] sm:$0xff]  ;;  %v980_v49 = vld [vmem:[%s870_s30 + $0xb8] sm:$0xff]  ;;  %v983_v50 = vld [vmem:[%s870_s30 + $0xa0] sm:$0xff]  ;;  %p685_p8 = scmp.lt.s32.totalorder %s1092_s28, %s683_s11  ;;  %p686_p10 = scmp.lt.s32.totalorder %s684_s13, %s678_s4 }
  0x40   : > { %v223_v42 = vadd.f32 %v185_v34, %v184_v33  ;;  %v220_v45 = vadd.f32 %v183_v37, %v182_v36  ;;  %v187_v47 = vmul.f32 %v966_v41, %v966_v41  ;;  %v986_v51 = vld [vmem:[%s870_s30 + $0xa8] sm:$0xff]  ;;  %v192_v53 = vmul.f32 %v977_v48, %v977_v48  ;;  %v997_v58 = vld [vmem:[%s870_s30 + $0xd0] sm:$0xff]  ;;  %v1000_v59 = vld [vmem:[%s870_s30 + $0xd8] sm:$0xff]  ;;  %p681_p13 = pneg %p680_p12 }
  0x41   : > { %212 = vadd.xlane.f32.xlu1 %v211_v22  ;;  %v229_v52 = vadd.f32 %v189_v44, %v188_v43  ;;  %v193_v54 = vmul.f32 %v980_v49, %v980_v49  ;;  %v190_v56 = vmul.f32 %v983_v50, %v983_v50  ;;  %v191_v57 = vmul.f32 %v986_v51, %v986_v51  ;;  %v1003_v60 = vld [vmem:[%s870_s30 + $0xc0] sm:$0xff]  ;;  %v1006_v61 = vld [vmem:[%s870_s30 + $0xc8] sm:$0xff]  ;;  %v1017_v10 = vld [vmem:[%s870_s30 + $0xf0] sm:$0xff]  ;;  %p687_p0 = por %p686_p10, %p685_p8 }
  0x42   : > { %206 = vadd.xlane.f32.xlu0 %v205_v25  ;;  %v226_v55 = vadd.f32 %v187_v47, %v186_v46  ;;  %v196_v63 = vmul.f32 %v997_v58, %v997_v58  ;;  %v197_v3 = vmul.f32 %v1000_v59, %v1000_v59  ;;  %v194_v6 = vmul.f32 %v1003_v60, %v1003_v60  ;;  %v1020_v11 = vld [vmem:[%s870_s30 + $0xf8] sm:$0xff]  ;;  %v1023_v15 = vld [vmem:[%s870_s30 + $0xe0] sm:$0xff]  ;;  %v1026_v16 = vld [vmem:[%s870_s30 + $0xe8] sm:$0xff] }
  0x43   : > { %v235_v62 = vadd.f32 %v193_v54, %v192_v53  ;;  %v232_v4 = vadd.f32 %v191_v57, %v190_v56  ;;  %v195_v9 = vmul.f32 %v1006_v61, %v1006_v61  ;;  %v200_v21 = vmul.f32 %v1017_v10, %v1017_v10  ;;  %p688_p2 = pnand %p687_p0, %p681_p13 }
  0x44   : > { %v241_v17 = vadd.f32 %v197_v3, %v196_v63  ;;  %v201_v22 = vmul.f32 %v1020_v11, %v1020_v11  ;;  %v198_v24 = vmul.f32 %v1023_v15, %v1023_v15  ;;  %v199_v25 = vmul.f32 %v1026_v16, %v1026_v16 }
  0x45   : > { %218 = vadd.xlane.f32.xlu1 %v217_v32  ;;  %v238_v23 = vadd.f32 %v195_v9, %v194_v6 }
  0x46   : > { %215 = vadd.xlane.f32.xlu0 %v214_v35  ;;  %v247_v26 = vadd.f32 %v201_v22, %v200_v21  ;;  %v244_v27 = vadd.f32 %v199_v25, %v198_v24 }
  0x49   : > { %224 = vadd.xlane.f32.xlu1 %v223_v42 }
  0x4a   : > { %221 = vadd.xlane.f32.xlu0 %v220_v45 }
  0x4d   : > { %230 = vadd.xlane.f32.xlu1 %v229_v52 }
  0x4e   : > { %227 = vadd.xlane.f32.xlu0 %v226_v55 }
  0x51   : > { %236 = vadd.xlane.f32.xlu1 %v235_v62 }
  0x52   : > { %233 = vadd.xlane.f32.xlu0 %v232_v4 }
  0x55   : > { %242 = vadd.xlane.f32.xlu1 %v241_v17 }
  0x56   : > { %239 = vadd.xlane.f32.xlu0 %v238_v23 }
  0x59   : > { %248 = vadd.xlane.f32.xlu1 %v247_v26 }
  0x5a   : > { %245 = vadd.xlane.f32.xlu0 %v244_v27 }
  0xca   : > { %v210_v32 = vpop.xlane.xlu1 %209 }
  0xcb   : > { %v252_v33 = vmax.f32 %v210_v32, 1e-24  ;;  %v204_v34 = vpop.xlane.xlu0 %203 }
  0xcc   : > { %v250_v35 = vmax.f32 %v204_v34, 1e-24 }
  0xcd   : > { %616 = vrsqrt.f32 %v252_v33 }
  0xce   : > { %618 = vrsqrt.f32 %v250_v35  ;;  %v213_v36 = vpop.xlane.xlu1 %212 }
  0xcf   : > { %v253_v37 = vmax.f32 %v213_v36, 1e-24  ;;  %v207_v42 = vpop.xlane.xlu0 %206 }
  0xd0   : > { %v251_v43 = vmax.f32 %v207_v42, 1e-24 }
  0xd1   : > { %620 = vrsqrt.f32 %v253_v37 }
  0xd2   : > { %622 = vrsqrt.f32 %v251_v43  ;;  %v219_v44 = vpop.xlane.xlu1 %218 }
  0xd3   : > { %v255_v45 = vmax.f32 %v219_v44, 1e-24  ;;  %v216_v46 = vpop.xlane.xlu0 %215 }
  0xd4   : > { %v254_v47 = vmax.f32 %v216_v46, 1e-24 }
  0xd5   : > { %624 = vrsqrt.f32 %v255_v45 }
  0xd6   : > { %626 = vrsqrt.f32 %v254_v47  ;;  %v225_v52 = vpop.xlane.xlu1 %224 }
  0xd7   : > { %v617_v53 = vpop.eup %616  ;;  %v257_v54 = vmax.f32 %v225_v52, 1e-24  ;;  %v222_v55 = vpop.xlane.xlu0 %221 }
  0xd8   : > { %v619_v56 = vpop.eup %618  ;;  %v286_v57 = vmul.f32 %v617_v53, %v877_v0  ;;  %v287_v62 = vmul.f32 %v617_v53, %v880_v1  ;;  %v256_v63 = vmax.f32 %v222_v55, 1e-24 }
  0xd9   : > { %v282_v3 = vmul.f32 %v619_v56, %v883_v2  ;;  %v283_v4 = vmul.f32 %v619_v56, %v890_v5  ;;  %628 = vrsqrt.f32 %v257_v54 }
  0xda   : > { %v550_v6 = vpack.c.bf16 %v287_v62, %v286_v57  ;;  %630 = vrsqrt.f32 %v256_v63  ;;  %v231_v9 = vpop.xlane.xlu1 %230 }
  0xdb   : > { %v621_v17 = vpop.eup %620  ;;  %v548_v21 = vpack.c.bf16 %v283_v4, %v282_v3  ;;  %v259_v22 = vmax.f32 %v231_v9, 1e-24  ;;  %v228_v23 = vpop.xlane.xlu0 %227 }
  0xdc   : > { %v623_v24 = vpop.eup %622  ;;  %412 = vst [vmem:[%s1041_s25 + $0x10] sm:$0xff] %v550_v6  ;;  %v288_v0 = vmul.f32 %v621_v17, %v895_v7  ;;  %v289_v1 = vmul.f32 %v621_v17, %v898_v8  ;;  %v258_v2 = vmax.f32 %v228_v23, 1e-24 }
  0xdd   : > { %410 = vst [vmem:[%s1041_s25] sm:$0xff] %v548_v21  ;;  %v284_v5 = vmul.f32 %v623_v24, %v907_v12  ;;  %v285_v25 = vmul.f32 %v623_v24, %v910_v13  ;;  %632 = vrsqrt.f32 %v259_v22 }
  0xde   : > { %v551_v26 = vpack.c.bf16 %v289_v1, %v288_v0  ;;  %634 = vrsqrt.f32 %v258_v2  ;;  %v237_v27 = vpop.xlane.xlu1 %236 }
  0xdf   : > { %v625_v32 = vpop.eup %624  ;;  %v549_v33 = vpack.c.bf16 %v285_v25, %v284_v5  ;;  %v261_v34 = vmax.f32 %v237_v27, 1e-24  ;;  %v234_v35 = vpop.xlane.xlu0 %233 }
  0xe0   : > { %v627_v36 = vpop.eup %626  ;;  %413 = vst [vmem:[%s1041_s25 + $0x18] sm:$0xff] %v551_v26  ;;  %v292_v7 = vmul.f32 %v625_v32, %v913_v14  ;;  %v293_v8 = vmul.f32 %v625_v32, %v920_v18  ;;  %v260_v37 = vmax.f32 %v234_v35, 1e-24 }
  0xe1   : > { %411 = vst [vmem:[%s1041_s25 + $0x8] sm:$0xff] %v549_v33  ;;  %v290_v12 = vmul.f32 %v627_v36, %v923_v19  ;;  %v291_v13 = vmul.f32 %v627_v36, %v926_v20  ;;  %636 = vrsqrt.f32 %v261_v34 }
  0xe2   : > { %v553_v42 = vpack.c.bf16 %v293_v8, %v292_v7  ;;  %638 = vrsqrt.f32 %v260_v37  ;;  %v243_v43 = vpop.xlane.xlu1 %242 }
  0xe3   : > { %v629_v44 = vpop.eup %628  ;;  %v552_v45 = vpack.c.bf16 %v291_v13, %v290_v12  ;;  %v263_v46 = vmax.f32 %v243_v43, 1e-24  ;;  %v240_v47 = vpop.xlane.xlu0 %239 }
  0xe4   : > { %v631_v52 = vpop.eup %630  ;;  %415 = vst [vmem:[%s1041_s25 + $0x28] sm:$0xff] %v553_v42  ;;  %v296_v14 = vmul.f32 %v629_v44, %v937_v28  ;;  %v297_v18 = vmul.f32 %v629_v44, %v940_v29  ;;  %v262_v53 = vmax.f32 %v240_v47, 1e-24 }
  0xe5   : > { %414 = vst [vmem:[%s1041_s25 + $0x20] sm:$0xff] %v552_v45  ;;  %v294_v19 = vmul.f32 %v631_v52, %v943_v30  ;;  %v295_v20 = vmul.f32 %v631_v52, %v946_v31  ;;  %640 = vrsqrt.f32 %v263_v46 }
  0xe6   : > { %v555_v54 = vpack.c.bf16 %v297_v18, %v296_v14  ;;  %642 = vrsqrt.f32 %v262_v53  ;;  %v249_v55 = vpop.xlane.xlu1 %248 }
  0xe7   : > { %v633_v56 = vpop.eup %632  ;;  %v554_v57 = vpack.c.bf16 %v295_v20, %v294_v19  ;;  %v265_v62 = vmax.f32 %v249_v55, 1e-24  ;;  %v246_v63 = vpop.xlane.xlu0 %245 }
  0xe8   : > { %v635_v3 = vpop.eup %634  ;;  %417 = vst [vmem:[%s1041_s25 + $0x38] sm:$0xff] %v555_v54  ;;  %v300_v28 = vmul.f32 %v633_v56, %v957_v38  ;;  %v301_v29 = vmul.f32 %v633_v56, %v960_v39  ;;  %v264_v4 = vmax.f32 %v246_v63, 1e-24 }
  0xe9   : > { %416 = vst [vmem:[%s1041_s25 + $0x30] sm:$0xff] %v554_v57  ;;  %v298_v30 = vmul.f32 %v635_v3, %v963_v40  ;;  %v299_v31 = vmul.f32 %v635_v3, %v966_v41  ;;  %644 = vrsqrt.f32 %v265_v62 }
  0xea   : > { %v557_v6 = vpack.c.bf16 %v301_v29, %v300_v28  ;;  %646 = vrsqrt.f32 %v264_v4 }
  0xeb   : > { %v637_v9 = vpop.eup %636  ;;  %v556_v17 = vpack.c.bf16 %v299_v31, %v298_v30 }
  0xec   : > { %v639_v21 = vpop.eup %638  ;;  %419 = vst [vmem:[%s1041_s25 + $0x48] sm:$0xff] %v557_v6  ;;  %v304_v22 = vmul.f32 %v637_v9, %v977_v48  ;;  %v305_v38 = vmul.f32 %v637_v9, %v980_v49 }
  0xed   : > { %418 = vst [vmem:[%s1041_s25 + $0x40] sm:$0xff] %v556_v17  ;;  %v302_v39 = vmul.f32 %v639_v21, %v983_v50  ;;  %v303_v40 = vmul.f32 %v639_v21, %v986_v51 }
  0xee   : > { %v559_v41 = vpack.c.bf16 %v305_v38, %v304_v22 }
  0xef   : > { %v641_v23 = vpop.eup %640  ;;  %v558_v24 = vpack.c.bf16 %v303_v40, %v302_v39 }
  0xf0   : > { %v643_v0 = vpop.eup %642  ;;  %421 = vst [vmem:[%s1041_s25 + $0x58] sm:$0xff] %v559_v41  ;;  %v308_v1 = vmul.f32 %v641_v23, %v997_v58  ;;  %v309_v48 = vmul.f32 %v641_v23, %v1000_v59 }
  0xf1   : > { %420 = vst [vmem:[%s1041_s25 + $0x50] sm:$0xff] %v558_v24  ;;  %v306_v49 = vmul.f32 %v643_v0, %v1003_v60  ;;  %v307_v2 = vmul.f32 %v643_v0, %v1006_v61 }
  0xf2   : > { %v561_v50 = vpack.c.bf16 %v309_v48, %v308_v1 }
  0xf3   : > { %v645_v5 = vpop.eup %644  ;;  %v560_v51 = vpack.c.bf16 %v307_v2, %v306_v49 }
  0xf4   : > { %v647_v25 = vpop.eup %646  ;;  %423 = vst [vmem:[%s1041_s25 + $0x68] sm:$0xff] %v561_v50  ;;  %v312_v58 = vmul.f32 %v645_v5, %v1017_v10  ;;  %v313_v59 = vmul.f32 %v645_v5, %v1020_v11 }
  0xf5   : > { %422 = vst [vmem:[%s1041_s25 + $0x60] sm:$0xff] %v560_v51  ;;  %v310_v60 = vmul.f32 %v647_v25, %v1023_v15  ;;  %v311_v61 = vmul.f32 %v647_v25, %v1026_v16 }
  0xf6   : > { %v563_v26 = vpack.c.bf16 %v313_v59, %v312_v58 }
  0xf7   : > { %v562_v27 = vpack.c.bf16 %v311_v61, %v310_v60 }
  0xf8   : > { %425 = vst [vmem:[%s1041_s25 + $0x78] sm:$0xff] %v563_v26 }
  0xf9   : > { %424 = vst [vmem:[%s1041_s25 + $0x70] sm:$0xff] %v562_v27 }
  0xfa   : > { %691 = shalt.err (!%p688_p2)
}
  0xfb   : > { %s692_s14 = scalar_lea.hbm %s1090_s3, 2048  ;;  %s696_s21 = scalar_lea.hbm %s1139_s1, 4096 }
  0xfc   : > { %p693_p4 = scmp.ne.s32.totalorder %s1090_s3, %s692_s14  ;;  %p697_p9 = scmp.lt.u32.totalorder %s1090_s3, %s1139_s1 }
  0xfd   : > { %p698_p1 = scmp.lt.u32.totalorder %s696_s21, %s692_s14  ;;  %p700_p6 = scmp.lt.u32.totalorder %s692_s14, %s1090_s3 }
  0xfe   : > { %p694_p5 = pnand %p693_p4, %p1146_p11 }
  0xff   : > { %p699_p3 = por %p698_p1, %p697_p9 }
 0x100   : > { %p695_p7 = pneg %p694_p5 }
 0x101   : > { %p701_p12 = por %p700_p6, %p699_p3 }
 0x103   : > { %p702_p13 = pnand %p701_p12, %p695_p7 }
 0x105   : > { %705 = shalt.err (!%p702_p13)
}
 0x106   : > { %s750_s26 = smov 128   ;;  %s751_s30 = smov 8  }
 0x107   : > { %568 = dma.vmem_to_hbm [thread:$0]  (%p1146_p11), %s1092_s28, 2048, %s1090_s3, %s427_s10, %s750_s26, %s750_s26, %s751_s30  }
 0x108 PF: > { %s456_s17 = sand.u32 1, %s732_s6   ;;  %p1147_p8 = scmp.ne.s32.totalorder %s1144_s19, 0 }
 0x109   : > { %p1148_p10 = scmp.ge.s32.totalorder %s744_s9, 2  ;;  %s457_s25 = scalar_lea.sflag [#allocation4], %s456_s17 }
 0x10b   : > { %p575_p0 = pnand %p1148_p10, %p1147_p8 }
 0x10d   : > { %727 = dma.done.wait (!%p575_p0), %s457_s25, 2048  }
 0x10e   : > { %729 = vsyncadd (!%p575_p0), %s457_s25, 4294965248  ;;  %p14_p2 = scmp.ge.s32.totalorder %s787_s12, 4   ;;  %s1149_s6 = smov %s736_s7 }
 0x10f   : > { %s1150_s7 = smov %s740_s8  ;;  %s1151_s8 = smov %s799_s15 }
 0x110   : > { %s1152_s9 = smov %s787_s12  ;;  %16 = sbr.rel (!%p14_p2) target bundleno = 5 (0x5), region = 69 }
 0x117   :  { %462 = vsyncpa [#allocation3], 1 }
 0x118   :  { %464 = vsyncpa [#allocation3 + $0x1], 1 }
 0x119   :  { %465 = vsyncpa [#allocation4], 1 }
 0x11a   :  { %467 = vsyncpa [#allocation4 + $0x1], 1 }

</bundles_post_ra>
